<compile_context>
chip_gen: v7x
topology: tpu7x:2x2x1
jax: 0.10.0
libtpu: 0.0.40
codegen_flags: <defaults>
</compile_context>

<pallas_src>
import math
import jax
import jax.numpy as jnp
from jax.experimental import pallas as pl
from jax.experimental.pallas import tpu as pltpu


def _round_up(x, m):
    return (x + m - 1) // m * m


# ----------------------------------------------------------------------------
# Pallas kernel
# ----------------------------------------------------------------------------
def _nbnorm_kernel(x_ref, wn_ref, bn_ref, wp_ref, bp_ref, n_ref, p_ref):
    # x: (c_in, TM)   wn/wp: (c_out, c_in)   bn/bp: (c_out, 1)
    # n/p outputs: (c_out, TM)  — lane-dense stores along the B*N axis.
    x = x_ref[...]

    # ---- softplus head -----------------------------------------------------
    yn = jnp.dot(wn_ref[...], x, preferred_element_type=jnp.float32) + bn_ref[...]
    ezn = jnp.exp(-jnp.abs(yn))
    # softplus(y) = max(y, 0) + log(1 + exp(-|y|)); ezn in (0, 1] so plain log
    # is within ~1e-7 abs of log1p and uses only guaranteed-lowerable ops.
    n_ref[...] = jnp.maximum(yn, 0.0) + jnp.log(1.0 + ezn)

    # ---- sigmoid head (single shared reciprocal) ----------------------------
    yp = jnp.dot(wp_ref[...], x, preferred_element_type=jnp.float32) + bp_ref[...]
    ezp = jnp.exp(-jnp.abs(yp))
    r = 1.0 / (1.0 + ezp)
    p_ref[...] = jnp.where(yp >= 0.0, r, ezp * r)


# ----------------------------------------------------------------------------
# Wrapper (layout plumbing stays in plain JAX)
# ----------------------------------------------------------------------------
def nbnorm_forward(x, wn, bn, wp, bp, *, max_lane_tile=2048):
    """x: (B, N, c_in, 1); wn/wp: (c_out, c_in, 1, 1); bn/bp: (c_out,).
    Returns (n, p), each (B, N, c_out), matching NBNorm.forward."""
    B, N, c_in, last = x.shape
    assert last == 1, "NBNorm forward requires a trailing singleton dim"
    c_out = wn.shape[0]
    R = B * N

    # Rows (B*N) onto the lane axis; tiny feature dims onto sublanes.
    xt = x[..., 0].reshape(R, c_in).T.astype(jnp.float32)        # (c_in, R)
    wn2 = wn[:, :, 0, 0].astype(jnp.float32)                     # (c_out, c_in)
    wp2 = wp[:, :, 0, 0].astype(jnp.float32)
    bn2 = bn.astype(jnp.float32)[:, None]                        # (c_out, 1)
    bp2 = bp.astype(jnp.float32)[:, None]

    # Lane tile: multiple of 128 (or the full extent for tiny R), aiming for
    # >= 2 grid steps so both v7x TensorCores get work.  No HBM padding —
    # Pallas handles the partial tail block.
    if R <= 256:
        TM = R
    else:
        TM = min(max_lane_tile, _round_up(pl.cdiv(R, 2), 128))
    grid = (pl.cdiv(R, TM),)

    n_t, p_t = pl.pallas_call(
        _nbnorm_kernel,
        grid=grid,
        in_specs=[
            pl.BlockSpec((c_in, TM), lambda i: (0, i)),     # x, lane-tiled
            pl.BlockSpec((c_out, c_in), lambda i: (0, 0)),  # Wn (grid-invariant)
            pl.BlockSpec((c_out, 1), lambda i: (0, 0)),     # bn
            pl.BlockSpec((c_out, c_in), lambda i: (0, 0)),  # Wp
            pl.BlockSpec((c_out, 1), lambda i: (0, 0)),     # bp
        ],
        out_specs=[
            pl.BlockSpec((c_out, TM), lambda i: (0, i)),    # softplus head
            pl.BlockSpec((c_out, TM), lambda i: (0, i)),    # sigmoid head
        ],
        out_shape=(
            jax.ShapeDtypeStruct((c_out, R), jnp.float32),
            jax.ShapeDtypeStruct((c_out, R), jnp.float32),
        ),
        compiler_params=pltpu.CompilerParams(
            dimension_semantics=("parallel",)),
    )(xt, wn2, bn2, wp2, bp2)

    # (c_out, B*N) -> (B, N, c_out) to match the torch output layout.
    n = n_t.T.reshape(B, N, c_out)
    p = p_t.T.reshape(B, N, c_out)
    return n, p


# ----------------------------------------------------------------------------
# Deterministic parameter init (mirrors torch Conv2d default bounds)
# ----------------------------------------------------------------------------
def init_params(key, c_in, c_out):
    k1, k2, k3, k4 = jax.random.split(key, 4)
    bound = 1.0 / math.sqrt(c_in)
    wn = jax.random.uniform(k1, (c_out, c_in, 1, 1), jnp.float32, -bound, bound)
    bn = jax.random.uniform(k2, (c_out,), jnp.float32, -bound, bound)
    wp = jax.random.uniform(k3, (c_out, c_in, 1, 1), jnp.float32, -bound, bound)
    bp = jax.random.uniform(k4, (c_out,), jnp.float32, -bound, bound)
    return wn, bn, wp, bp


# ----------------------------------------------------------------------------
# Pure-JAX reference (faithful port of the torch forward) for validation
# ----------------------------------------------------------------------------
def nbnorm_reference(x, wn, bn, wp, bp):
    hp = jax.lax.Precision.HIGHEST
    xf = x[..., 0]                                        # (B, N, c_in)
    n = jnp.einsum('bni,oi->bno', xf, wn[:, :, 0, 0], precision=hp) + bn
    p = jnp.einsum('bni,oi->bno', xf, wp[:, :, 0, 0], precision=hp) + bp
    return jax.nn.softplus(n), jax.nn.sigmoid(p)


# ----------------------------------------------------------------------------
if __name__ == "__main__":
    B, N, C_IN, C_OUT = 2, 16, 4, 8   # batch, nodes, in-channels, out-channels

    key = jax.random.PRNGKey(0)
    k_x, k_p = jax.random.split(key)

    # x laid out as the torch forward expects: (B, N, c_in, 1)
    X = jax.random.normal(k_x, (B, N, C_IN, 1), jnp.float32)
    wn, bn, wp, bp = init_params(k_p, C_IN, C_OUT)

    n, p = nbnorm_forward(X, wn, bn, wp, bp)
    jax.block_until_ready((n, p))

    n_ref, p_ref = nbnorm_reference(X, wn, bn, wp, bp)

    assert n.shape == (B, N, C_OUT) and p.shape == (B, N, C_OUT)
    assert bool(jnp.allclose(n, n_ref, atol=1e-4, rtol=1e-4)), "softplus head mismatch"
    assert bool(jnp.allclose(p, p_ref, atol=1e-4, rtol=1e-4)), "sigmoid head mismatch"
    print("KERNEL_OK")
</pallas_src>

<mosaic_0001>
module attributes {stable_mosaic.version = 11 : i64} {
  func.func @_nbnorm_kernel(%arg0: i32, %arg1: memref<4x32xf32, #tpu.memory_space<vmem>>, %arg2: memref<8x4xf32, #tpu.memory_space<vmem>>, %arg3: memref<8x1xf32, #tpu.memory_space<vmem>>, %arg4: memref<8x4xf32, #tpu.memory_space<vmem>>, %arg5: memref<8x1xf32, #tpu.memory_space<vmem>>, %arg6: memref<8x32xf32, #tpu.memory_space<vmem>>, %arg7: memref<8x32xf32, #tpu.memory_space<vmem>>) attributes {dimension_semantics = [#tpu.dimension_semantics<parallel>], iteration_bounds = array<i64: 1>, scalar_prefetch = 0 : i64, scratch_operands = 0 : i64, tpu.core_type = #tpu.core_type<tc>, window_params = [{transform_indices = @transform_0, window_bounds = array<i64: 4, 32>}, {pipeline_mode = #tpu.pipeline_mode<synchronous>, transform_indices = @transform_1, window_bounds = array<i64: 8, 4>}, {pipeline_mode = #tpu.pipeline_mode<synchronous>, transform_indices = @transform_2, window_bounds = array<i64: 8, 1>}, {pipeline_mode = #tpu.pipeline_mode<synchronous>, transform_indices = @transform_3, window_bounds = array<i64: 8, 4>}, {pipeline_mode = #tpu.pipeline_mode<synchronous>, transform_indices = @transform_4, window_bounds = array<i64: 8, 1>}, {transform_indices = @transform_5, window_bounds = array<i64: 8, 32>}, {transform_indices = @transform_6, window_bounds = array<i64: 8, 32>}]} {
    %c0 = arith.constant 0 : index
    %c0_0 = arith.constant 0 : index
    %0 = vector.load %arg1[%c0, %c0_0] : memref<4x32xf32, #tpu.memory_space<vmem>>, vector<4x32xf32>
    %c0_1 = arith.constant 0 : index
    %c0_2 = arith.constant 0 : index
    %1 = vector.load %arg2[%c0_1, %c0_2] : memref<8x4xf32, #tpu.memory_space<vmem>>, vector<8x4xf32>
    %cst = arith.constant dense<0.000000e+00> : vector<8x32xf32>
    %2 = tpu.matmul %1, %0, %cst {dimension_numbers = #tpu.dot_dimension_numbers<[1], [0], [0], [1], [0, 0, 1, 1], [], []>} : vector<8x4xf32>, vector<4x32xf32>, vector<8x32xf32> -> vector<8x32xf32>
    %c0_3 = arith.constant 0 : index
    %c0_4 = arith.constant 0 : index
    %3 = vector.load %arg3[%c0_3, %c0_4] : memref<8x1xf32, #tpu.memory_space<vmem>>, vector<8x1xf32>
    %4 = vector.broadcast %3 : vector<8x1xf32> to vector<8x32xf32>
    %5 = arith.addf %2, %4 : vector<8x32xf32>
    %6 = math.absf %5 : vector<8x32xf32>
    %cst_5 = arith.constant 0.000000e+00 : f32
    %7 = vector.broadcast %cst_5 : f32 to vector<8x32xf32>
    %8 = arith.subf %7, %6 : vector<8x32xf32>
    %9 = math.exp %8 : vector<8x32xf32>
    %cst_6 = arith.constant 0.000000e+00 : f32
    %10 = vector.broadcast %cst_6 : f32 to vector<8x32xf32>
    %11 = arith.maximumf %5, %10 : vector<8x32xf32>
    %cst_7 = arith.constant 1.000000e+00 : f32
    %12 = vector.broadcast %cst_7 : f32 to vector<8x32xf32>
    %13 = arith.addf %12, %9 : vector<8x32xf32>
    %14 = math.log %13 : vector<8x32xf32>
    %15 = arith.addf %11, %14 : vector<8x32xf32>
    %c0_8 = arith.constant 0 : index
    %c0_9 = arith.constant 0 : index
    %16 = vector.load %arg6[%c0_8, %c0_9] : memref<8x32xf32, #tpu.memory_space<vmem>>, vector<8x32xf32>
    tpu.vector_store %arg6[%c0_8, %c0_9], %15 {strides = array<i32>} : memref<8x32xf32, #tpu.memory_space<vmem>>, vector<8x32xf32>,
    %c0_10 = arith.constant 0 : index
    %c0_11 = arith.constant 0 : index
    %17 = vector.load %arg4[%c0_10, %c0_11] : memref<8x4xf32, #tpu.memory_space<vmem>>, vector<8x4xf32>
    %cst_12 = arith.constant dense<0.000000e+00> : vector<8x32xf32>
    %18 = tpu.matmul %17, %0, %cst_12 {dimension_numbers = #tpu.dot_dimension_numbers<[1], [0], [0], [1], [0, 0, 1, 1], [], []>} : vector<8x4xf32>, vector<4x32xf32>, vector<8x32xf32> -> vector<8x32xf32>
    %c0_13 = arith.constant 0 : index
    %c0_14 = arith.constant 0 : index
    %19 = vector.load %arg5[%c0_13, %c0_14] : memref<8x1xf32, #tpu.memory_space<vmem>>, vector<8x1xf32>
    %20 = vector.broadcast %19 : vector<8x1xf32> to vector<8x32xf32>
    %21 = arith.addf %18, %20 : vector<8x32xf32>
    %22 = math.absf %21 : vector<8x32xf32>
    %cst_15 = arith.constant 0.000000e+00 : f32
    %23 = vector.broadcast %cst_15 : f32 to vector<8x32xf32>
    %24 = arith.subf %23, %22 : vector<8x32xf32>
    %25 = math.exp %24 : vector<8x32xf32>
    %cst_16 = arith.constant 1.000000e+00 : f32
    %26 = vector.broadcast %cst_16 : f32 to vector<8x32xf32>
    %27 = arith.addf %26, %25 : vector<8x32xf32>
    %cst_17 = arith.constant 1.000000e+00 : f32
    %28 = vector.broadcast %cst_17 : f32 to vector<8x32xf32>
    %29 = arith.divf %28, %27 : vector<8x32xf32>
    %cst_18 = arith.constant 0.000000e+00 : f32
    %30 = vector.broadcast %cst_18 : f32 to vector<8x32xf32>
    %31 = arith.cmpf oge, %21, %30 : vector<8x32xf32>
    %32 = arith.mulf %25, %29 : vector<8x32xf32>
    %33 = arith.select %31, %29, %32 : vector<8x32xi1>, vector<8x32xf32>
    %c0_19 = arith.constant 0 : index
    %c0_20 = arith.constant 0 : index
    %34 = vector.load %arg7[%c0_19, %c0_20] : memref<8x32xf32, #tpu.memory_space<vmem>>, vector<8x32xf32>
    tpu.vector_store %arg7[%c0_19, %c0_20], %33 {strides = array<i32>} : memref<8x32xf32, #tpu.memory_space<vmem>>, vector<8x32xf32>,
    return
  }
  func.func @transform_0(%arg0: i32) -> (i32, i32) {
    %c0_i32 = arith.constant 0 : i32
    %c0_i32_0 = arith.constant 0 : i32
    return %c0_i32, %arg0 : i32, i32
  }
  func.func @transform_1(%arg0: i32) -> (i32, i32) {
    %c0_i32 = arith.constant 0 : i32
    %c0_i32_0 = arith.constant 0 : i32
    %c0_i32_1 = arith.constant 0 : i32
    return %c0_i32, %c0_i32_0 : i32, i32
  }
  func.func @transform_2(%arg0: i32) -> (i32, i32) {
    %c0_i32 = arith.constant 0 : i32
    %c0_i32_0 = arith.constant 0 : i32
    %c0_i32_1 = arith.constant 0 : i32
    return %c0_i32, %c0_i32_0 : i32, i32
  }
  func.func @transform_3(%arg0: i32) -> (i32, i32) {
    %c0_i32 = arith.constant 0 : i32
    %c0_i32_0 = arith.constant 0 : i32
    %c0_i32_1 = arith.constant 0 : i32
    return %c0_i32, %c0_i32_0 : i32, i32
  }
  func.func @transform_4(%arg0: i32) -> (i32, i32) {
    %c0_i32 = arith.constant 0 : i32
    %c0_i32_0 = arith.constant 0 : i32
    %c0_i32_1 = arith.constant 0 : i32
    return %c0_i32, %c0_i32_0 : i32, i32
  }
  func.func @transform_5(%arg0: i32) -> (i32, i32) {
    %c0_i32 = arith.constant 0 : i32
    %c0_i32_0 = arith.constant 0 : i32
    return %c0_i32, %arg0 : i32, i32
  }
  func.func @transform_6(%arg0: i32) -> (i32, i32) {
    %c0_i32 = arith.constant 0 : i32
    %c0_i32_0 = arith.constant 0 : i32
    return %c0_i32, %arg0 : i32, i32
  }
}

</mosaic_0001>

<bundles_post_ra>
// kernel: tpu_custom_call.1
= control target key start
LH: loop header
LB: loop body
LE: loop exit
PB: predicated region body
PF: predicated region fallthrough
CT: control target
= control target key end

     0   :  { %12 = vsyncpa [#allocation3], 0  ;;  %vm36_vm0 = vcmask 1043456   ;;  %v320_v1 = vmov 0.0   ;;  %vm32_vm1 = vcmask 31744   ;;  %vm321_vm2 = vmmov 0   ;;  %s399_s0 = inlined_call_operand.vmem [shape: f32[4,32], index: 0, kind: input, shape index: {}]   ;;  %s400_s1 = inlined_call_operand.vmem [shape: f32[8,4], index: 1, kind: input, shape index: {}]   ;;  %s401_s2 = inlined_call_operand.vmem [shape: f32[8,1], index: 2, kind: input, shape index: {}]   ;;  %s402_s3 = inlined_call_operand.vmem [shape: f32[8,4], index: 3, kind: input, shape index: {}]   ;;  %s403_s4 = inlined_call_operand.vmem [shape: f32[8,1], index: 4, kind: input, shape index: {}]   ;;  %s404_s5 = inlined_call_operand.hbm [shape: f32[8,32], index: 5, kind: output, shape index: {0}]   ;;  %s405_s6 = inlined_call_operand.hbm [shape: f32[8,32], index: 6, kind: output, shape index: {1}]  }
   0x1   :  { %v24_v0 = vld [vmem:[%s399_s0] sm:$0xf]  ;;  %248 = vmatprep.subr.mxu0 %v320_v1  ;;  %253 = vmatprep.subr.mxu1 %v320_v1 }
   0x2   :  { %v25_v2 = vld [vmem:[%s400_s1] sm:$0xff]  ;;  %249 = vmatpush3.msk.msra.mxu0 %vm36_vm0, %v24_v0  ;;  %250 = vmatprep.mubr.msk.f32.mxu0 %vm321_vm2, %v320_v1 }
   0x3   :  { %v121_v3 = vld [vmem:[%s402_s3] sm:$0xff] }
   0x4   :  { %13 = vsyncpa [#allocation5], 0  ;;  %254 = vmatpush3.msk.msra.mxu1 %vm36_vm0, %v24_v0  ;;  %255 = vmatprep.mubr.msk.f32.mxu1 %vm321_vm2, %v320_v1  ;;  %v26_v4 = vld [vmem:[%s401_s2] sm:$0xff]  ;;  %v322_v5 = vmov 0   ;;  %s323_s2 = smov [#allocation2]   ;;  %vm119_vm3 = vcmask 261120  }
   0x5   :  { %251 = vmatmul.mubr.msk.f32.vlgmr.msra.gmra.mrb[0].mxu0 %vm32_vm1, %v25_v2  ;;  %256 = vmatmul.mubr.msk.f32.vlgmr.msra.gmra.mrb[0].mxu1 %vm32_vm1, %v121_v3  ;;  %v122_v6 = vld [vmem:[%s403_s4] sm:$0xff]  ;;  %s218_s3 = sshll.u32 %s323_s2, 4  ;;  %s324_s4 = smov [#allocation4]   ;;  %s219_s3 = int_to_ptr.vmem [resolvable:$true] %s218_s3 }
   0x6   :  { %263 = vset.pattern.permute.xlu0 %v322_v5  ;;  %s228_s29 = sshll.u32 %s324_s4, 4  ;;  %s272_s30 = scalar_lea.vmem %s219_s3, 128  ;;  %s229_s29 = int_to_ptr.vmem [resolvable:$true] %s228_s29 }
   0x7   :  { %29 = vperm.xlu0 %263, %v26_v4   ;;  %p273_p0 = scmp.ne.s32.totalorder %s219_s3, %s272_s30  ;;  %p277_p1 = scmp.lt.s32.totalorder %s219_s3, %s219_s3 }
   0x8   :  { %p278_p2 = scmp.lt.s32.totalorder %s272_s30, %s272_s30 }
   0xa   :  { %p279_p3 = por %p278_p2, %p277_p1 }
   0xb   :  { %125 = vperm.xlu0 %263, %v122_v6  }
   0xc   :  { %p280_p4 = pnand %p279_p3, %p273_p0 }
  0x86   :  { %v30_v7 = vpop.permute.xlu0 %29 }
  0x8a   :  { %v126_v8 = vpop.permute.xlu0 %125 }
  0xd8   :  { %v106_v9 = vpop.f32.mrb[0].mxu0  ;;  %v197_v10 = vpop.f32.mrb[0].mxu1 }
  0xd9   :  { %v107_v11 = vadd.f32 %v106_v9, %v30_v7  ;;  %v198_v12 = vadd.f32 %v197_v10, %v126_v8  ;;  %v252_v13 = vpop.f32.mrb[1].mxu0  ;;  %v257_v14 = vpop.f32.mrb[1].mxu1 }
  0xdb   :  { %v110_v15 = vand.u32 2147483647, %v107_v11  ;;  %v201_v16 = vand.u32 2147483647, %v198_v12  ;;  %v114_v27 = vmax.f32 %v107_v11, 0.0  ;;  %vm208_vm4 = vcmp.ge.f32.partialorder %v198_v12, 0.0 }
  0xdd   :  { %v111_v17 = vsub.f32 0.0, %v110_v15  ;;  %v202_v18 = vsub.f32 0.0, %v201_v16 }
  0xdf   :  { %v112_v19 = vmul.f32 1.442695, %v111_v17  ;;  %v203_v20 = vmul.f32 1.442695, %v202_v18 }
  0xe1   :  { %264 = vpow2.f32 %v112_v19 }
  0xe2   :  { %266 = vpow2.f32 %v203_v20 }
  0xeb   :  { %v265_v21 = vpop.eup %264 }
  0xec   :  { %v267_v22 = vpop.eup %266  ;;  %v115_v23 = vadd.f32 1.0, %v265_v21 }
  0xed   :  { %v205_v24 = vadd.f32 1.0, %v267_v22 }
  0xee   :  { %268 = vlog2.f32 %v115_v23 }
  0xef   :  { %270 = vrcp.f32 %v205_v24 }
  0xf8   :  { %v269_v25 = vpop.eup %268 }
  0xf9   :  { %v271_v26 = vpop.eup %270  ;;  %v117_v28 = vmul.f32 0.6931472, %v269_v25 }
  0xfa   :  { %v209_v29 = vmul.f32 %v271_v26, %v267_v22 }
  0xfb   :  { %v118_v30 = vadd.f32 %v117_v28, %v114_v27 }
  0xfc   :  { %v210_v31 = vsel %vm208_vm4, %v271_v26, %v209_v29 }
  0xfd   :  { %120 = vst.msk [vmem:[#allocation2] sm:$0xff] %vm119_vm3, %v118_v30  ;;  %211 = vst.msk [vmem:[#allocation4] sm:$0xff] %vm119_vm3, %v210_v31 }
  0xfe   :  { %283 = shalt.err (!%p280_p4)
}
  0xff   :  { %s284_s9 = scalar_lea.hbm %s404_s5, 128 }
 0x100   :  { %p285_p5 = scmp.ne.s32.totalorder %s404_s5, %s284_s9  ;;  %p288_p6 = scmp.lt.u32.totalorder %s284_s9, %s404_s5 }
 0x102   :  { %p290_p7 = pnand %p288_p6, %p285_p5 }
 0x104   :  { %293 = shalt.err (!%p290_p7)
}
 0x105   :  { %221 = dma.vmem_to_hbm [thread:$0]  %s219_s3, 128, %s404_s5, [#allocation3]  }
 0x106   :  { %s294_s16 = scalar_lea.vmem %s229_s29, 128  ;;  %p299_p9 = scmp.lt.s32.totalorder %s229_s29, %s229_s29 }
 0x107   :  { %p295_p8 = scmp.ne.s32.totalorder %s229_s29, %s294_s16  ;;  %p300_p10 = scmp.lt.s32.totalorder %s294_s16, %s294_s16 }
 0x109   :  { %p301_p11 = por %p300_p10, %p299_p9 }
 0x10b   :  { %p302_p12 = pnand %p301_p11, %p295_p8 }
 0x10d   :  { %305 = shalt.err (!%p302_p12)
}
 0x10e   :  { %s306_s19 = scalar_lea.hbm %s405_s6, 128 }
 0x10f   :  { %p307_p13 = scmp.ne.s32.totalorder %s405_s6, %s306_s19  ;;  %p310_p0 = scmp.lt.u32.totalorder %s306_s19, %s405_s6 }
 0x111   :  { %p312_p1 = pnand %p310_p0, %p307_p13 }
 0x113   :  { %315 = shalt.err (!%p312_p1)
}
 0x114   :  { %231 = dma.vmem_to_hbm [thread:$0]  %s229_s29, 128, %s405_s6, [#allocation5]  }
 0x115   :  { %316 = dma.done.wait [#allocation3], 128  }
 0x116   :  { %317 = vsyncadd [#allocation3], 4294967168 }
 0x117   :  { %318 = dma.done.wait [#allocation5], 128  }
 0x118   :  { %319 = vsyncadd [#allocation5], 4294967168 }
 0x119   :  { %238 = vsyncpa [#allocation3], 1 }
 0x11a   :  { %239 = vsyncpa [#allocation5], 1 }

</bundles_post_ra>
